<compile_context>
chip_gen: v6e
topology: v6e:2x2x1
jax: 0.10.0
libtpu: 0.0.40
codegen_flags: <defaults>
</compile_context>

<pallas_src>
import functools

import jax
import jax.numpy as jnp
from jax import lax
from jax.experimental import pallas as pl
from jax.experimental.pallas import tpu as pltpu


def _channel_attention_kernel(x_ref, w1_ref, b1_ref, w2_ref, b2_ref, o_ref, *,
                              inv_hw, hw_valid):
    """Fused global-pool -> MLP -> sigmoid -> rescale for Bt batch elements.

    x_ref:  [Bt, C, HWp]  input feature maps (NCHW, H*W flattened, lane-padded)
    w1_ref: [Ch, C]       fc1 weight (torch layout [out, in]), Ch = C // reduction_ratio
    b1_ref: [Ch, 1]       fc1 bias
    w2_ref: [C, Ch]       fc2 weight
    b2_ref: [C, 1]        fc2 bias
    o_ref:  [Bt, C, HWp]  x * sigmoid(mlp(avg) + mlp(max)) per channel
    """
    bt = x_ref.shape[0]
    hwp = x_ref.shape[-1]

    # Padded lanes (if any) are zero: harmless for the sum/avg, masked out of the max.
    lane = None
    if hw_valid != hwp:
        lane = lax.broadcasted_iota(jnp.int32, (x_ref.shape[1], hwp), 1)   # [C, HWp]

    # ---- pooling: build one [C, 2*Bt] matrix of pooled columns ----------------
    # Columns are (avg_0, max_0, avg_1, max_1, ...); C stays on sublanes so the
    # whole chain down to the final lane-broadcast needs no relayout.
    cols = []
    for b in range(bt):
        xb = x_ref[b].astype(jnp.float32)                               # [C, HWp]
        cols.append(jnp.sum(xb, axis=-1, keepdims=True) * inv_hw)       # avg_b [C, 1]
        xm = xb if lane is None else jnp.where(lane < hw_valid, xb, -jnp.inf)
        cols.append(jnp.max(xm, axis=-1, keepdims=True))                # max_b [C, 1]
    pooled = jnp.concatenate(cols, axis=-1)                             # [C, 2*Bt]

    # ---- shared MLP: ONE fc1 / fc2 dot pair covers all Bt elements & branches --
    # (bias is intentionally applied to every column: mlp(avg)+mlp(max) has the
    #  bias once per branch, so the per-element column sum below is exact.)
    h = jnp.dot(w1_ref[...], pooled, preferred_element_type=jnp.float32) + b1_ref[...]
    h = jnp.maximum(h, 0.0)                                             # [Ch, 2*Bt]
    att = jnp.dot(w2_ref[...], h, preferred_element_type=jnp.float32) + b2_ref[...]  # [C, 2*Bt]

    # ---- sigmoid + broadcast rescale (memory-bound part) ----------------------
    for b in range(bt):
        att_b = att[:, 2 * b:2 * b + 1] + att[:, 2 * b + 1:2 * b + 2]   # [C, 1]
        # 1 / (1 + exp(-att)); exp and the approx reciprocal both run on the EUP.
        scale_b = pl.reciprocal(1.0 + jnp.exp(-att_b), approx=True)
        o_ref[b] = (x_ref[b].astype(jnp.float32) * scale_b).astype(o_ref.dtype)


def _pick_batch_tile(B, C, HW_pad, itemsize):
    """Batch elements per grid step.

    Keep >= 2 grid steps (v7x: one per TensorCore) and >= 4 when B allows
    (pipeline depth on v5e/v6e), and cap Bt so double-buffered in+out blocks
    stay ~<= 24 MiB (comfortable inside v7x's 64 MiB physical VMEM).
    """
    per_elem = C * HW_pad * itemsize
    vmem_cap = max(1, (24 << 20) // (4 * per_elem))          # 2 in + 2 out buffers
    min_steps = 2 if B < 4 else 4
    bt_max = max(1, min(vmem_cap, B // min_steps if B >= min_steps else 1))
    bt = 1
    for d in range(1, bt_max + 1):                           # largest divisor of B <= bt_max
        if B % d == 0:
            bt = d
    return bt


def channel_attention_forward(x, params, *, batch_tile=None):
    """x: [B, C, H, W] -> [B, C, H, W] (x * per-channel attention)."""
    B, C, H, W = x.shape
    HW = H * W
    HW_pad = ((HW + 127) // 128) * 128          # lane-dense blocks -> unmasked stores

    w1 = params['w1'].astype(jnp.float32)       # [Ch, C]
    b1 = params['b1'].reshape(-1, 1).astype(jnp.float32)   # [Ch, 1]
    w2 = params['w2'].astype(jnp.float32)       # [C, Ch]
    b2 = params['b2'].reshape(-1, 1).astype(jnp.float32)   # [C, 1]
    ch = w1.shape[0]

    x2 = x.reshape(B, C, HW)                    # free: contiguous last-dim merge
    if HW_pad != HW:
        x2 = jnp.pad(x2, ((0, 0), (0, 0), (0, HW_pad - HW)))

    bt = batch_tile if batch_tile is not None else _pick_batch_tile(
        B, C, HW_pad, x2.dtype.itemsize)
    assert B % bt == 0, (B, bt)
    grid = (B // bt,)

    # Scoped-VMEM budget: double-buffered input + output blocks, resident weights,
    # plus headroom for compiler-internal scratch.
    block_bytes = bt * C * HW_pad * x2.dtype.itemsize
    weight_bytes = 4 * (w1.size + b1.size + w2.size + b2.size)
    vmem_limit = int(min(100 << 20,
                         max(2 * (2 * block_bytes) + 2 * weight_bytes + (4 << 20),
                             16 << 20)))

    kernel = functools.partial(_channel_attention_kernel,
                               inv_hw=1.0 / HW, hw_valid=HW)
    out = pl.pallas_call(
        kernel,
        out_shape=jax.ShapeDtypeStruct((B, C, HW_pad), x2.dtype),
        grid=grid,
        in_specs=[
            pl.BlockSpec((bt, C, HW_pad), lambda i: (i, 0, 0)),   # x (Bt elements/step)
            pl.BlockSpec((ch, C), lambda i: (0, 0)),              # fc1 weight (resident)
            pl.BlockSpec((ch, 1), lambda i: (0, 0)),              # fc1 bias
            pl.BlockSpec((C, ch), lambda i: (0, 0)),              # fc2 weight
            pl.BlockSpec((C, 1), lambda i: (0, 0)),               # fc2 bias
        ],
        out_specs=pl.BlockSpec((bt, C, HW_pad), lambda i: (i, 0, 0)),
        compiler_params=pltpu.CompilerParams(
            dimension_semantics=("parallel",),                    # batches independent
            vmem_limit_bytes=vmem_limit),
    )(x2, w1, b1, w2, b2)

    if HW_pad != HW:
        out = out[..., :HW]
    return out.reshape(B, C, H, W)


def channel_attention_reference(x, params):
    """Pure-JAX reference matching the PyTorch forward (pool_types=['avg','max'])."""
    avg = jnp.mean(x, axis=(2, 3))                             # [B, C]
    mx = jnp.max(x, axis=(2, 3))                               # [B, C]
    w1, b1 = params['w1'], params['b1'].reshape(1, -1)
    w2, b2 = params['w2'], params['b2'].reshape(1, -1)

    def mlp(v):
        h = jnp.maximum(v @ w1.T + b1, 0.0)
        return h @ w2.T + b2

    att = mlp(avg) + mlp(mx)
    scale = 1.0 / (1.0 + jnp.exp(-att))
    return x * scale[:, :, None, None]


def make_params(key, input_channels, reduction_ratio=16):
    hidden = input_channels // reduction_ratio
    k1, k2, k3, k4 = jax.random.split(key, 4)
    s1 = (2.0 / input_channels) ** 0.5
    s2 = (2.0 / hidden) ** 0.5
    return {
        'w1': jax.random.normal(k1, (hidden, input_channels), jnp.float32) * s1,
        'b1': jax.random.normal(k2, (hidden, 1), jnp.float32) * 0.1,
        'w2': jax.random.normal(k3, (input_channels, hidden), jnp.float32) * s2,
        'b2': jax.random.normal(k4, (input_channels, 1), jnp.float32) * 0.1,
    }


if __name__ == "__main__":
    key = jax.random.PRNGKey(0)
    pkey, xkey, pkey2, xkey2 = jax.random.split(key, 4)

    # Config 1: channel_attention(64), reduction_ratio=16 (hidden=4), as used in
    # d3s_rgbd_DIF02's DWNet.  B=2 -> Bt=1, grid=(2,) (one element per TC on v7x).
    B, C, H, W = 2, 64, 16, 16
    params = make_params(pkey, C, reduction_ratio=16)
    x = jax.random.normal(xkey, (B, C, H, W), jnp.float32)
    out = channel_attention_forward(x, params)
    jax.block_until_ready(out)
    assert out.shape == (B, C, H, W), out.shape
    ref = channel_attention_reference(x, params)
    err = float(jnp.max(jnp.abs(out - ref)))
    assert err < 2e-2, f"config1 max abs error vs reference: {err}"

    # Config 2: larger batch (Bt=2 per grid step -> one shared MXU pass covers 4
    # pooled vectors) and H*W=324 (not a multiple of 128) to exercise the
    # lane-padding + masked-max path.
    B2, C2, H2, W2 = 8, 64, 18, 18
    params2 = make_params(pkey2, C2, reduction_ratio=16)
    x2 = jax.random.normal(xkey2, (B2, C2, H2, W2), jnp.float32)
    out2 = channel_attention_forward(x2, params2)
    jax.block_until_ready(out2)
    assert out2.shape == (B2, C2, H2, W2), out2.shape
    ref2 = channel_attention_reference(x2, params2)
    err2 = float(jnp.max(jnp.abs(out2 - ref2)))
    assert err2 < 2e-2, f"config2 max abs error vs reference: {err2}"

    print("KERNEL_OK")
</pallas_src>

<mosaic_0001>
module attributes {stable_mosaic.version = 11 : i64} {
  func.func @_channel_attention_kernel(%arg0: i32, %arg1: memref<1x64x256xf32, #tpu.memory_space<vmem>>, %arg2: memref<4x64xf32, #tpu.memory_space<vmem>>, %arg3: memref<4x1xf32, #tpu.memory_space<vmem>>, %arg4: memref<64x4xf32, #tpu.memory_space<vmem>>, %arg5: memref<64x1xf32, #tpu.memory_space<vmem>>, %arg6: memref<1x64x256xf32, #tpu.memory_space<vmem>>) attributes {dimension_semantics = [#tpu.dimension_semantics<parallel>], iteration_bounds = array<i64: 2>, scalar_prefetch = 0 : i64, scratch_operands = 0 : i64, tpu.core_type = #tpu.core_type<tc>, window_params = [{transform_indices = @transform_0, window_bounds = array<i64: 1, 64, 256>}, {pipeline_mode = #tpu.pipeline_mode<synchronous>, transform_indices = @transform_1, window_bounds = array<i64: 4, 64>}, {pipeline_mode = #tpu.pipeline_mode<synchronous>, transform_indices = @transform_2, window_bounds = array<i64: 4, 1>}, {pipeline_mode = #tpu.pipeline_mode<synchronous>, transform_indices = @transform_3, window_bounds = array<i64: 64, 4>}, {pipeline_mode = #tpu.pipeline_mode<synchronous>, transform_indices = @transform_4, window_bounds = array<i64: 64, 1>}, {transform_indices = @transform_5, window_bounds = array<i64: 1, 64, 256>}]} {
    %c0 = arith.constant 0 : index
    %c0_0 = arith.constant 0 : index
    %c0_1 = arith.constant 0 : index
    %0 = vector.load %arg1[%c0, %c0_0, %c0_1] : memref<1x64x256xf32, #tpu.memory_space<vmem>>, vector<1x64x256xf32>
    %1 = vector.shape_cast %0 : vector<1x64x256xf32> to vector<64x256xf32>
    %cst = arith.constant dense<0.000000e+00> : vector<64xf32>
    %2 = vector.multi_reduction <add>, %1, %cst [1] : vector<64x256xf32> to vector<64xf32>
    %3 = vector.shape_cast %2 : vector<64xf32> to vector<64x1xf32>
    %cst_2 = arith.constant 3.906250e-03 : f32
    %4 = vector.broadcast %cst_2 : f32 to vector<64x1xf32>
    %5 = arith.mulf %3, %4 : vector<64x1xf32>
    %cst_3 = arith.constant dense<0xFF800000> : vector<64xf32>
    %6 = vector.multi_reduction <maximumf>, %1, %cst_3 [1] : vector<64x256xf32> to vector<64xf32>
    %7 = vector.shape_cast %6 : vector<64xf32> to vector<64x1xf32>
    %8 = tpu.concatenate %5, %7 in 1 : vector<64x1xf32>, vector<64x1xf32> -> vector<64x2xf32>
    %c0_4 = arith.constant 0 : index
    %c0_5 = arith.constant 0 : index
    %9 = vector.load %arg2[%c0_4, %c0_5] : memref<4x64xf32, #tpu.memory_space<vmem>>, vector<4x64xf32>
    %cst_6 = arith.constant dense<0.000000e+00> : vector<4x2xf32>
    %10 = tpu.matmul %9, %8, %cst_6 {dimension_numbers = #tpu.dot_dimension_numbers<[1], [0], [0], [1], [0, 0, 1, 1], [], []>} : vector<4x64xf32>, vector<64x2xf32>, vector<4x2xf32> -> vector<4x2xf32>
    %c0_7 = arith.constant 0 : index
    %c0_8 = arith.constant 0 : index
    %11 = vector.load %arg3[%c0_7, %c0_8] : memref<4x1xf32, #tpu.memory_space<vmem>>, vector<4x1xf32>
    %12 = vector.broadcast %11 : vector<4x1xf32> to vector<4x2xf32>
    %13 = arith.addf %10, %12 : vector<4x2xf32>
    %cst_9 = arith.constant 0.000000e+00 : f32
    %14 = vector.broadcast %cst_9 : f32 to vector<4x2xf32>
    %15 = arith.maximumf %13, %14 : vector<4x2xf32>
    %c0_10 = arith.constant 0 : index
    %c0_11 = arith.constant 0 : index
    %16 = vector.load %arg4[%c0_10, %c0_11] : memref<64x4xf32, #tpu.memory_space<vmem>>, vector<64x4xf32>
    %cst_12 = arith.constant dense<0.000000e+00> : vector<64x2xf32>
    %17 = tpu.matmul %16, %15, %cst_12 {dimension_numbers = #tpu.dot_dimension_numbers<[1], [0], [0], [1], [0, 0, 1, 1], [], []>} : vector<64x4xf32>, vector<4x2xf32>, vector<64x2xf32> -> vector<64x2xf32>
    %c0_13 = arith.constant 0 : index
    %c0_14 = arith.constant 0 : index
    %18 = vector.load %arg5[%c0_13, %c0_14] : memref<64x1xf32, #tpu.memory_space<vmem>>, vector<64x1xf32>
    %19 = vector.broadcast %18 : vector<64x1xf32> to vector<64x2xf32>
    %20 = arith.addf %17, %19 : vector<64x2xf32>
    %21 = vector.extract_strided_slice %20 {offsets = [0, 0], sizes = [64, 1], strides = [1, 1]} : vector<64x2xf32> to vector<64x1xf32>
    %22 = vector.extract_strided_slice %20 {offsets = [0, 1], sizes = [64, 1], strides = [1, 1]} : vector<64x2xf32> to vector<64x1xf32>
    %23 = arith.addf %21, %22 : vector<64x1xf32>
    %cst_15 = arith.constant 0.000000e+00 : f32
    %24 = vector.broadcast %cst_15 : f32 to vector<64x1xf32>
    %25 = arith.subf %24, %23 : vector<64x1xf32>
    %26 = math.exp %25 : vector<64x1xf32>
    %cst_16 = arith.constant 1.000000e+00 : f32
    %27 = vector.broadcast %cst_16 : f32 to vector<64x1xf32>
    %28 = arith.addf %27, %26 : vector<64x1xf32>
    %29 = tpu.reciprocal %28 {approx = true} : vector<64x1xf32> -> vector<64x1xf32>
    %c0_17 = arith.constant 0 : index
    %c0_18 = arith.constant 0 : index
    %c0_19 = arith.constant 0 : index
    %30 = vector.load %arg1[%c0_17, %c0_18, %c0_19] : memref<1x64x256xf32, #tpu.memory_space<vmem>>, vector<1x64x256xf32>
    %31 = vector.shape_cast %30 : vector<1x64x256xf32> to vector<64x256xf32>
    %32 = vector.broadcast %29 : vector<64x1xf32> to vector<64x256xf32>
    %33 = arith.mulf %31, %32 : vector<64x256xf32>
    %c0_20 = arith.constant 0 : index
    %c0_21 = arith.constant 0 : index
    %c0_22 = arith.constant 0 : index
    %34 = vector.load %arg6[%c0_20, %c0_21, %c0_22] : memref<1x64x256xf32, #tpu.memory_space<vmem>>, vector<1x64x256xf32>
    %35 = vector.shape_cast %34 : vector<1x64x256xf32> to vector<64x256xf32>
    %36 = vector.shape_cast %33 : vector<64x256xf32> to vector<1x64x256xf32>
    tpu.vector_store %arg6[%c0_20, %c0_21, %c0_22], %36 {strides = array<i32>} : memref<1x64x256xf32, #tpu.memory_space<vmem>>, vector<1x64x256xf32>,
    return
  }
  func.func @transform_0(%arg0: i32) -> (i32, i32, i32) {
    %c0_i32 = arith.constant 0 : i32
    %c0_i32_0 = arith.constant 0 : i32
    %c0_i32_1 = arith.constant 0 : i32
    return %arg0, %c0_i32, %c0_i32_0 : i32, i32, i32
  }
  func.func @transform_1(%arg0: i32) -> (i32, i32) {
    %c0_i32 = arith.constant 0 : i32
    %c0_i32_0 = arith.constant 0 : i32
    %c0_i32_1 = arith.constant 0 : i32
    return %c0_i32, %c0_i32_0 : i32, i32
  }
  func.func @transform_2(%arg0: i32) -> (i32, i32) {
    %c0_i32 = arith.constant 0 : i32
    %c0_i32_0 = arith.constant 0 : i32
    %c0_i32_1 = arith.constant 0 : i32
    return %c0_i32, %c0_i32_0 : i32, i32
  }
  func.func @transform_3(%arg0: i32) -> (i32, i32) {
    %c0_i32 = arith.constant 0 : i32
    %c0_i32_0 = arith.constant 0 : i32
    %c0_i32_1 = arith.constant 0 : i32
    return %c0_i32, %c0_i32_0 : i32, i32
  }
  func.func @transform_4(%arg0: i32) -> (i32, i32) {
    %c0_i32 = arith.constant 0 : i32
    %c0_i32_0 = arith.constant 0 : i32
    %c0_i32_1 = arith.constant 0 : i32
    return %c0_i32, %c0_i32_0 : i32, i32
  }
  func.func @transform_5(%arg0: i32) -> (i32, i32, i32) {
    %c0_i32 = arith.constant 0 : i32
    %c0_i32_0 = arith.constant 0 : i32
    %c0_i32_1 = arith.constant 0 : i32
    return %arg0, %c0_i32, %c0_i32_0 : i32, i32, i32
  }
}

</mosaic_0001>

<bundles_post_ra>
// kernel: tpu_custom_call.1
= control target key start
LH: loop header
LB: loop body
LE: loop exit
PB: predicated region body
PF: predicated region fallthrough
CT: control target
= control target key end

     0   :  { %10 = vsyncpa [#allocation3], 0  ;;  %s1488_s0 = inlined_call_operand.hbm [shape: f32[2,64,256], index: 0, kind: input, shape index: {}]   ;;  %s1489_s1 = inlined_call_operand.vmem [shape: f32[4,64], index: 1, kind: input, shape index: {}]   ;;  %s1490_s2 = inlined_call_operand.vmem [shape: f32[4,1], index: 2, kind: input, shape index: {}]   ;;  %s1491_s3 = inlined_call_operand.vmem [shape: f32[64,4], index: 3, kind: input, shape index: {}]   ;;  %s1492_s4 = inlined_call_operand.vmem [shape: f32[64,1], index: 4, kind: input, shape index: {}]   ;;  %s1493_s5 = inlined_call_operand.hbm [shape: f32[2,64,256], index: 5, kind: output, shape index: {}]  }
   0x1   :  { %12 = vsyncpa [#allocation3 + $0x1], 0 }
   0x2   :  { %13 = vsyncpa [#allocation4], 0 }
   0x3   :  { %15 = vsyncpa [#allocation4 + $0x1], 0  ;;  %s1134_s18 = smov 0   ;;  %s1136_s19 = smov 0  }
   0x4   :  { %s1138_s20 = smov 0   ;;  %s1140_s21 = smov 0  }
   0x5 LB: > { %s1155_s22 = sadd.s32 4294967295, %s1092_s21   ;;  %s835_s23 = sadd.s32 4294967294, %s1092_s21   ;;  %s1092_s21 = sphi %s1140_s21, %s1508_s21   ;;  %s1088_s20 = sphi %s1138_s20, %s1507_s20   ;;  %s1084_s19 = sphi %s1136_s19, %s1506_s19   ;;  %s1080_s18 = sphi %s1134_s18, %s1505_s18  }
   0x6   : > { %s1159_s24 = sadd.s32 1, %s1092_s21   ;;  %s28_s25 = sadd.s32 1, %s1088_s20 }
   0x7   : > { %s25_s26 = ssub.s32 %s1092_s21, %s1159_s24  ;;  %p35_p0 = scmp.ne.s32.totalorder %s1088_s20, %s1084_s19 }
   0x8   : > { %p26_p1 = scmp.eq.s32.totalorder %s25_s26, 0  ;;  %p36_p2 = scmp.eq.s32.totalorder %s1092_s21, 0 }
   0x9   : > { %p41_p3 = scmp.ne.s32.totalorder %s1084_s19, %s1080_s18  ;;  %p42_p4 = scmp.eq.s32.totalorder %s1155_s22, 0 }
   0xa   : > { %s1171_s27 = scalar_select %p26_p1, %s1088_s20, %s28_s25  }
   0xb   : > { %p1173_p5 = por %p36_p2, %p35_p0  ;;  %p1177_p6 = por %p42_p4, %p41_p3 }
   0xc   : > { %p149_p7 = scmp.eq.s32.totalorder %s1155_s22, 1  ;;  %p155_p8 = scmp.eq.s32.totalorder %s835_s23, 1 }
   0xd   : > { %s1497_s29 = scalar_select %p1177_p6, 1, 0 }
   0xe   : > { %p924_p10 = scmp.lt.s32.totalorder %s1092_s21, 2  ;;  %p1184_p11 = por %p149_p7, %p35_p0 }
   0xf   : > { %p1188_p12 = por %p155_p8, %p41_p3  ;;  %s187_s7 = sand.u32 1, %s1088_s20  }
  0x10   : > { %s1498_s30 = scalar_select %p1184_p11, 1, 0 }
  0x11   : > { %s1499_s6 = scalar_select %p1188_p12, 1, 0 }
  0x12   : > { %s859_s8 = sshll.u32 %s1092_s21, 11  ;;  %s838_s9 = sshll.u32 %s187_s7, 7 }
  0x13   : > { %s1197_s12 = scalar_lea.hbm %s1488_s0, %s859_s8  ;;  %s191_s13 = scalar_lea.vmem [#allocation2], %s838_s9 }
  0x14   : > { %s198_s14 = sshll.u32 %s191_s13, 4  ;;  %p1201_p13 = pnand %p924_p10, %p1173_p5  ;;  %s1205_s14 = int_to_ptr.vmem [resolvable:$true] %s198_s14 }
  0x15   : > { %s1207_s16 = scalar_lea.sflag [#allocation3], %s187_s7  ;;  %s1000_s17 = scalar_lea.hbm %s1197_s12, 2048 }
  0x16   : > { %p1001_p0 = scmp.ne.s32.totalorder %s1197_s12, %s1000_s17  ;;  %p1002_p1 = pneg %p1201_p13 }
  0x17   : > { %s1005_s26 = scalar_lea.hbm %s1488_s0, 4096  ;;  %p1006_p4 = scmp.lt.s32.totalorder %s1197_s12, %s1488_s0 }
  0x18   : > { %p1003_p2 = pnand %p1002_p1, %p1001_p0  ;;  %p1007_p5 = scmp.lt.s32.totalorder %s1005_s26, %s1000_s17 }
  0x1a   : > { %p1004_p3 = pneg %p1003_p2  ;;  %p1008_p7 = por %p1007_p5, %p1006_p4 }
  0x1c   : > { %p1009_p8 = pnand %p1008_p7, %p1004_p3 }
  0x1e   : > { %1012 = shalt.err (!%p1009_p8)
}
  0x1f   : > { %s1013_s7 = scalar_lea.vmem %s1205_s14, 2048  ;;  %s1094_s9 = smov [#allocation2]  }
  0x20   : > { %p1014_p10 = scmp.ne.s32.totalorder %s1205_s14, %s1013_s7  ;;  %s1018_s10 = sshll.u32 %s1094_s9, 4  ;;  %s1019_s10 = int_to_ptr.vmem [resolvable:$false] %s1018_s10 }
  0x21   : > { %s1020_s11 = scalar_lea.vmem %s1019_s10, 4096  ;;  %p1021_p2 = scmp.lt.s32.totalorder %s1205_s14, %s1019_s10 }
  0x22   : > { %p1016_p9 = pnand %p1014_p10, %p1002_p1  ;;  %p1022_p12 = scmp.lt.s32.totalorder %s1020_s11, %s1013_s7 }
  0x24   : > { %p1017_p0 = pneg %p1016_p9  ;;  %p1023_p11 = por %p1022_p12, %p1021_p2 }
  0x26   : > { %p1024_p6 = pnand %p1023_p11, %p1017_p0 }
  0x28   : > { %1027 = shalt.err (!%p1024_p6)
}
  0x29   : > { %s1095_s13 = smov 256   ;;  %s1096_s17 = smov 16  }
  0x2a   : > { %919 = dma.hbm_to_vmem [thread:$0]  (!%p1201_p13), %s1197_s12, 2048, %s1205_s14, %s1207_s16, %s1095_s13, %s1095_s13, %s1096_s17  }
  0x2b   : > { %p841_p9 = scmp.ge.s32.totalorder %s1092_s21, 1  ;;  %p206_p1 = scmp.lt.s32.totalorder %s1092_s21, 3 }
  0x2d   : > { %p207_p3 = pnand %p841_p9, %p206_p1 }
  0x2e   : > { %s1231_s23 = sand.u32 (!%p207_p3), 1, %s1084_s19   ;;  %p1501_p6 = scmp.ne.s32.totalorder (!%p207_p3), %s1497_s29, 0 }
  0x2f   : > { %210 = sbr.rel (%p207_p3) target bundleno = 925 (0x39d), region = 40  ;;  %s842_s25 = sshll.u32 (!%p207_p3), %s1231_s23, 7 }
  0x30   : > { %s213_s26 = scalar_lea.sflag (!%p207_p3), [#allocation3], %s1231_s23  ;;  %s1237_s28 = scalar_lea.vmem (!%p207_p3), [#allocation2], %s842_s25 }
  0x34   : > { %1071 = dma.done.wait (%p1501_p6), %s213_s26, 2048  }
  0x35   : > { %1073 = vsyncadd (%p1501_p6), %s213_s26, 4294965248  ;;  %v1244_v0 = vld [vmem:[%s1237_s28 + $0x70] sm:$0xff]  ;;  %v1247_v1 = vld [vmem:[%s1237_s28 + $0x78] sm:$0xff]  ;;  %v1097_v20 = vmov 0.0   ;;  %vm1098_vm0 = vmmov 0   ;;  %v1099_v33 = vmov 0  }
  0x36   : > { %v1250_v2 = vld [vmem:[%s1237_s28 + $0x60] sm:$0xff]  ;;  %v312_v3 = vmax.f32 %v1244_v0, %v1247_v1  ;;  %v280_v4 = vadd.f32 %v1247_v1, %v1244_v0  ;;  %v1257_v5 = vld [vmem:[%s1237_s28 + $0x68] sm:$0xff]  ;;  %v1260_v6 = vld [vmem:[%s1237_s28 + $0x50] sm:$0xff]  ;;  %879 = vmatprep.subr.mxu0 %v1097_v20  ;;  %895 = vmatprep.mubr.msk.f32.mxu0 %vm1098_vm0, %v1097_v20  ;;  %vm315_vm1 = vcmask 7168   ;;  %vm331_vm2 = vcmask 523264   ;;  %s1100_s10 = smov 127  }
  0x37   : > { %v1263_v7 = vld [vmem:[%s1237_s28 + $0x58] sm:$0xff]  ;;  %v277_v8 = vadd.f32 %v1257_v5, %v1250_v2  ;;  %v1270_v10 = vld [vmem:[%s1237_s28 + $0x40] sm:$0xff]  ;;  %v1273_v11 = vld [vmem:[%s1237_s28 + $0x48] sm:$0xff]  ;;  %v309_v12 = vmax.f32 %v1250_v2, %v1257_v5  ;;  %966 = vset.pattern.permute.xlu0 %v1099_v33  ;;  %967 = vset.pattern.permute.xlu1 %v1099_v33  ;;  %vm462_vm3 = vcmask 31744   ;;  %vm487_vm4 = vcmask 1043456   ;;  %s1406_s11 = scalar_lea.vmem [#allocation5], %s842_s25 }
  0x38   : > { %313 = vmax.xlane.f32.xlu1 %v312_v3  ;;  %281 = vadd.xlane.f32.xlu0 %v280_v4  ;;  %v274_v9 = vadd.f32 %v1263_v7, %v1260_v6  ;;  %v271_v13 = vadd.f32 %v1273_v11, %v1270_v10  ;;  %v1280_v14 = vld [vmem:[%s1237_s28 + $0x30] sm:$0xff]  ;;  %v1283_v15 = vld [vmem:[%s1237_s28 + $0x38] sm:$0xff]  ;;  %v306_v16 = vmax.f32 %v1260_v6, %v1263_v7  ;;  %v1290_v18 = vld [vmem:[%s1237_s28 + $0x20] sm:$0xff]  ;;  %s860_s25 = sshll.u32 %s1155_s22, 11  ;;  %s762_s13 = sshll.u32 %s1406_s11, 4  ;;  %s1439_s13 = int_to_ptr.vmem [resolvable:$true] %s762_s13 }
  0x39   : > { %v268_v17 = vadd.f32 %v1283_v15, %v1280_v14  ;;  %v1293_v19 = vld [vmem:[%s1237_s28 + $0x28] sm:$0xff]  ;;  %v303_v21 = vmax.f32 %v1270_v10, %v1273_v11  ;;  %v1301_v23 = vld [vmem:[%s1237_s28 + $0x10] sm:$0xff]  ;;  %v1304_v24 = vld [vmem:[%s1237_s28 + $0x18] sm:$0xff]  ;;  %v300_v25 = vmax.f32 %v1280_v14, %v1283_v15  ;;  %s749_s22 = scalar_lea.sflag [#allocation4], %s1231_s23  ;;  %s1028_s29 = scalar_lea.vmem %s1439_s13, 2048 }
  0x3a   : > { %v265_v22 = vadd.f32 %v1293_v19, %v1290_v18  ;;  %v262_v26 = vadd.f32 %v1304_v24, %v1301_v23  ;;  %v1311_v27 = vld [vmem:[%s1237_s28] sm:$0xff]  ;;  %v1314_v28 = vld [vmem:[%s1237_s28 + $0x8] sm:$0xff]  ;;  %v297_v29 = vmax.f32 %v1290_v18, %v1293_v19  ;;  %v294_v31 = vmax.f32 %v1301_v23, %v1304_v24  ;;  %s1437_s28 = scalar_lea.hbm %s1493_s5, %s860_s25  ;;  %p1029_p11 = scmp.ne.s32.totalorder %s1439_s13, %s1028_s29 }
  0x3b   : > { %v259_v30 = vadd.f32 %v1314_v28, %v1311_v27  ;;  %v291_v32 = vmax.f32 %v1311_v27, %v1314_v28  ;;  %v325_v34 = vld [vmem:[%s1490_s2] sm:$0xf]  ;;  %p1502_p12 = scmp.ne.s32.totalorder %s1498_s30, 0  ;;  %s1101_s12 = smov [#allocation5]  }
  0x3c   : > { %278 = vadd.xlane.f32.xlu0 %v277_v8  ;;  %275 = vadd.xlane.f32.xlu1 %v274_v9  ;;  %v324_v8 = vld [vmem:[%s1489_s1] sm:$0xf]  ;;  %s1032_s14 = sshll.u32 %s1101_s12, 4  ;;  %s1033_s14 = int_to_ptr.vmem [resolvable:$false] %s1032_s14 }
  0x3d   : > { %p1030_p13 = pnand %p1029_p11, %p1502_p12  ;;  %s1034_s15 = scalar_lea.vmem %s1033_s14, 4096 }
  0x3e   : > { %p1035_p5 = scmp.lt.s32.totalorder %s1439_s13, %s1033_s14  ;;  %p1036_p7 = scmp.lt.s32.totalorder %s1034_s15, %s1028_s29 }
  0x3f   : > { %p1031_p4 = pneg %p1030_p13 }
  0x40   : > { %310 = vmax.xlane.f32.xlu0 %v309_v12  ;;  %272 = vadd.xlane.f32.xlu1 %v271_v13  ;;  %v406_v12 = vld [vmem:[%s1491_s3] sm:$0xff]  ;;  %p1037_p8 = por %p1036_p7, %p1035_p5 }
  0x41   : > { %900 = vmatprep.mubr.msk.f32.mxu1 %vm462_vm3, %v406_v12  ;;  %v414_v13 = vld [vmem:[%s1492_s4] sm:$0xff] }
  0x42   : > { %p1038_p10 = pnand %p1037_p8, %p1031_p4 }
  0x44   : > { %307 = vmax.xlane.f32.xlu0 %v306_v16  ;;  %269 = vadd.xlane.f32.xlu1 %v268_v17  ;;  %v415_v16 = vld [vmem:[%s1492_s4 + $0x8] sm:$0xff]  ;;  %v416_v17 = vld [vmem:[%s1492_s4 + $0x10] sm:$0xff] }
  0x48   : > { %304 = vmax.xlane.f32.xlu0 %v303_v21  ;;  %266 = vadd.xlane.f32.xlu1 %v265_v22  ;;  %v418_v21 = vld [vmem:[%s1492_s4 + $0x20] sm:$0xff]  ;;  %v419_v22 = vld [vmem:[%s1492_s4 + $0x28] sm:$0xff] }
  0x4c   : > { %301 = vmax.xlane.f32.xlu0 %v300_v25  ;;  %263 = vadd.xlane.f32.xlu1 %v262_v26  ;;  %v420_v25 = vld [vmem:[%s1492_s4 + $0x30] sm:$0xff]  ;;  %v421_v26 = vld [vmem:[%s1492_s4 + $0x38] sm:$0xff] }
  0x50   : > { %298 = vmax.xlane.f32.xlu0 %v297_v29  ;;  %260 = vadd.xlane.f32.xlu1 %v259_v30 }
  0x54   : > { %295 = vmax.xlane.f32.xlu0 %v294_v31  ;;  %292 = vmax.xlane.f32.xlu1 %v291_v32 }
  0x65   : > { %424 = vperm.xlu1 %967, %v414_v13  }
  0x69   : > { %429 = vperm.xlu1 %967, %v415_v16  }
  0x6a   : > { %328 = vperm.xlu0 %966, %v325_v34   ;;  %v407_v34 = vld [vmem:[%s1491_s3 + $0x8] sm:$0xff] }
  0x6d   : > { %434 = vperm.xlu1 %967, %v416_v17  }
  0xc1   : > { %v314_v35 = vpop.xlane.xlu1 %313  ;;  %v282_v36 = vpop.xlane.xlu0 %281 }
  0xc2   : > { %v290_v37 = vmul.f32 0.00390625, %v282_v36  ;;  %v409_v36 = vld [vmem:[%s1491_s3 + $0x18] sm:$0xff] }
  0xc4   : > { %v323_v38 = vsel %vm315_vm1, %v290_v37, %v314_v35  ;;  %v408_v35 = vld [vmem:[%s1491_s3 + $0x10] sm:$0xff]  ;;  %v410_v37 = vld [vmem:[%s1491_s3 + $0x20] sm:$0xff] }
  0xc5   : > { %880 = vmatpush3.msra.mxu0 %v323_v38  ;;  %v279_v39 = vpop.xlane.xlu0 %278  ;;  %v276_v40 = vpop.xlane.xlu1 %275  ;;  %v411_v38 = vld [vmem:[%s1491_s3 + $0x28] sm:$0xff] }
  0xc6   : > { %881 = vmatprep.subr.mxu0 %v1097_v20  ;;  %v289_v41 = vmul.f32 0.00390625, %v279_v39  ;;  %v288_v45 = vmul.f32 0.00390625, %v276_v40  ;;  %v412_v39 = vld [vmem:[%s1491_s3 + $0x30] sm:$0xff]  ;;  %v413_v40 = vld [vmem:[%s1491_s3 + $0x38] sm:$0xff] }
  0xc9   : > { %v311_v42 = vpop.xlane.xlu0 %310  ;;  %v273_v43 = vpop.xlane.xlu1 %272 }
  0xca   : > { %v322_v44 = vsel %vm315_vm1, %v289_v41, %v311_v42  ;;  %v287_v49 = vmul.f32 0.00390625, %v273_v43 }
  0xcb   : > { %882 = vmatpush3.msra.mxu0 %v322_v44 }
  0xcc   : > { %883 = vmatprep.subr.mxu0 %v1097_v20 }
  0xcd   : > { %v308_v46 = vpop.xlane.xlu0 %307  ;;  %v270_v47 = vpop.xlane.xlu1 %269 }
  0xce   : > { %v321_v48 = vsel %vm315_vm1, %v288_v45, %v308_v46  ;;  %v286_v53 = vmul.f32 0.00390625, %v270_v47 }
  0xcf   : > { %884 = vmatpush3.msra.mxu0 %v321_v48 }
  0xd0   : > { %885 = vmatprep.subr.mxu0 %v1097_v20 }
  0xd1   : > { %v305_v50 = vpop.xlane.xlu0 %304  ;;  %v267_v51 = vpop.xlane.xlu1 %266 }
  0xd2   : > { %v320_v52 = vsel %vm315_vm1, %v287_v49, %v305_v50  ;;  %v285_v57 = vmul.f32 0.00390625, %v267_v51 }
  0xd3   : > { %886 = vmatpush3.msra.mxu0 %v320_v52 }
  0xd4   : > { %887 = vmatprep.subr.mxu0 %v1097_v20 }
  0xd5   : > { %v302_v54 = vpop.xlane.xlu0 %301  ;;  %v264_v55 = vpop.xlane.xlu1 %263 }
  0xd6   : > { %v319_v56 = vsel %vm315_vm1, %v286_v53, %v302_v54  ;;  %v284_v61 = vmul.f32 0.00390625, %v264_v55 }
  0xd7   : > { %888 = vmatpush3.msra.mxu0 %v319_v56 }
  0xd8   : > { %889 = vmatprep.subr.mxu0 %v1097_v20 }
  0xd9   : > { %v299_v58 = vpop.xlane.xlu0 %298  ;;  %v261_v59 = vpop.xlane.xlu1 %260 }
  0xda   : > { %v318_v60 = vsel %vm315_vm1, %v285_v57, %v299_v58  ;;  %v283_v62 = vmul.f32 0.00390625, %v261_v59 }
  0xdb   : > { %890 = vmatpush3.msra.mxu0 %v318_v60 }
  0xdc   : > { %891 = vmatprep.subr.mxu0 %v1097_v20 }
  0xdd   : > { %v296_v63 = vpop.xlane.xlu0 %295  ;;  %v293_v3 = vpop.xlane.xlu1 %292 }
  0xde   : > { %v317_v4 = vsel %vm315_vm1, %v284_v61, %v296_v63  ;;  %v316_v9 = vsel %vm315_vm1, %v283_v62, %v293_v3 }
  0xdf   : > { %892 = vmatpush3.msra.mxu0 %v317_v4 }
  0xe0   : > { %893 = vmatprep.subr.mxu0 %v1097_v20  ;;  %v417_v20 = vld [vmem:[%s1492_s4 + $0x18] sm:$0xff] }
  0xe1   : > { %894 = vmatpush3.msra.mxu0 %v316_v9  ;;  %439 = vperm.xlu1 %967, %v417_v20   ;;  %v425_v41 = vpop.permute.xlu1 %424 }
  0xe2   : > { %896 = vmatmul.mubr.msk.f32.vlgmr.msra.gmra.mxu0 %vm331_vm2, %v324_v8 }
  0xe5   : > { %444 = vperm.xlu1 %967, %v418_v21   ;;  %v329_v29 = vpop.permute.xlu0 %328  ;;  %v430_v42 = vpop.permute.xlu1 %429 }
  0xe9   : > { %449 = vperm.xlu1 %967, %v419_v22   ;;  %v435_v43 = vpop.permute.xlu1 %434 }
  0xed   : > { %454 = vperm.xlu1 %967, %v420_v25  }
  0xf1   : > { %459 = vperm.xlu1 %967, %v421_v26  }
 0x15c   : > { %v440_v44 = vpop.permute.xlu1 %439 }
 0x160   : > { %v445_v45 = vpop.permute.xlu1 %444 }
 0x164   : > { %v450_v46 = vpop.permute.xlu1 %449 }
 0x168   : > { %v455_v53 = vpop.permute.xlu1 %454 }
 0x16c   : > { %v460_v60 = vpop.permute.xlu1 %459 }
 0x1a2   : > { %v401_v30 = vpop.f32.mrf.mxu0 }
 0x1a3   : > { %v402_v31 = vadd.f32 %v401_v30, %v329_v29 }
 0x1a4   : > { %v897_v32 = vpop.f32.mrf.mxu0 }
 0x1a5   : > { %v405_v33 = vmax.f32 %v402_v31, 0.0 }
 0x1a7   : > { %898 = vmatprep.subr.msk.mxu1 %vm487_vm4, %v405_v33 }
 0x1a8   : > { %899 = vmatpush3.msk.msra.mxu1 %vm487_vm4, %v405_v33 }
 0x1a9   : > { %901 = vmatmul.mubr.msk.f32.vlgmr.msra.gmra.mxu1 %vm462_vm3, %v407_v34 }
 0x1aa   : > { %903 = vmatprep.mubr.msk.f32.mxu1 %vm462_vm3, %v408_v35 }
 0x1ad   : > { %904 = vmatmul.mubr.msk.f32.gmra.mxu1 %vm462_vm3, %v409_v36 }
 0x1ae   : > { %906 = vmatprep.mubr.msk.f32.mxu1 %vm462_vm3, %v410_v37 }
 0x1b1   : > { %907 = vmatmul.mubr.msk.f32.gmra.mxu1 %vm462_vm3, %v411_v38 }
 0x1b2   : > { %909 = vmatprep.mubr.msk.f32.mxu1 %vm462_vm3, %v412_v39 }
 0x1b5   : > { %910 = vmatmul.mubr.msk.f32.gmra.mxu1 %vm462_vm3, %v413_v40 }
 0x269   : > { %v902_v47 = vpop.f32.mrf.mxu1 }
 0x26a   : > { %v563_v48 = vadd.f32 %v902_v47, %v430_v42 }
 0x26b   : > { %v557_v49 = vpop.f32.mrf.mxu1 }
 0x26c   : > { %v558_v50 = vadd.f32 %v557_v49, %v425_v41  ;;  %606 = vrot.lane.b32.xlu1 %v563_v48, %s1100_s10 }
 0x26d   : > { %v905_v51 = vpop.f32.mrf.mxu1 }
 0x26e   : > { %v573_v52 = vadd.f32 %v905_v51, %v440_v44  ;;  %604 = vrot.lane.b32.xlu0 %v558_v50, %s1100_s10 }
 0x26f   : > { %v567_v54 = vpop.f32.mrf.mxu1 }
 0x270   : > { %v568_v55 = vadd.f32 %v567_v54, %v435_v43  ;;  %610 = vrot.lane.b32.xlu1 %v573_v52, %s1100_s10 }
 0x271   : > { %v908_v56 = vpop.f32.mrf.mxu1 }
 0x272   : > { %v583_v57 = vadd.f32 %v908_v56, %v450_v46  ;;  %608 = vrot.lane.b32.xlu0 %v568_v55, %s1100_s10 }
 0x273   : > { %v577_v58 = vpop.f32.mrf.mxu1 }
 0x274   : > { %v578_v59 = vadd.f32 %v577_v58, %v445_v45  ;;  %614 = vrot.lane.b32.xlu1 %v583_v57, %s1100_s10 }
 0x275   : > { %v911_v61 = vpop.f32.mrf.mxu1 }
 0x276   : > { %v593_v62 = vadd.f32 %v911_v61, %v460_v60  ;;  %612 = vrot.lane.b32.xlu0 %v578_v59, %s1100_s10 }
 0x277   : > { %v587_v63 = vpop.f32.mrf.mxu1 }
 0x278   : > { %v588_v3 = vadd.f32 %v587_v63, %v455_v53  ;;  %618 = vrot.lane.b32.xlu1 %v593_v62, %s1100_s10 }
 0x27a   : > { %616 = vrot.lane.b32.xlu0 %v588_v3, %s1100_s10 }
 0x2de   : > { %v607_v4 = vpop.permute.xlu1 %606 }
 0x2df   : > { %v629_v8 = vadd.f32 %v607_v4, %v563_v48 }
 0x2e0   : > { %v605_v9 = vpop.permute.xlu0 %604 }
 0x2e1   : > { %v637_v12 = vsub.f32 0.0, %v629_v8  ;;  %v628_v13 = vadd.f32 %v605_v9, %v558_v50 }
 0x2e2   : > { %v611_v16 = vpop.permute.xlu1 %610 }
 0x2e3   : > { %v646_v17 = vmul.f32 1.442695, %v637_v12  ;;  %v636_v20 = vsub.f32 0.0, %v628_v13  ;;  %v631_v21 = vadd.f32 %v611_v16, %v573_v52 }
 0x2e4   : > { %v609_v22 = vpop.permute.xlu0 %608 }
 0x2e5   : > { %968 = vpow2.f32 %v646_v17  ;;  %v644_v25 = vmul.f32 1.442695, %v636_v20  ;;  %v639_v26 = vsub.f32 0.0, %v631_v21  ;;  %v630_v29 = vadd.f32 %v609_v22, %v568_v55 }
 0x2e6   : > { %v615_v30 = vpop.permute.xlu1 %614 }
 0x2e7   : > { %970 = vpow2.f32 %v644_v25  ;;  %v650_v31 = vmul.f32 1.442695, %v639_v26  ;;  %v638_v32 = vsub.f32 0.0, %v630_v29  ;;  %v633_v33 = vadd.f32 %v615_v30, %v583_v57 }
 0x2e8   : > { %v613_v34 = vpop.permute.xlu0 %612 }
 0x2e9   : > { %972 = vpow2.f32 %v650_v31  ;;  %v648_v35 = vmul.f32 1.442695, %v638_v32  ;;  %v641_v36 = vsub.f32 0.0, %v633_v33  ;;  %v632_v37 = vadd.f32 %v613_v34, %v578_v59 }
 0x2ea   : > { %v619_v38 = vpop.permute.xlu1 %618 }
 0x2eb   : > { %974 = vpow2.f32 %v648_v35  ;;  %v654_v39 = vmul.f32 1.442695, %v641_v36  ;;  %v640_v40 = vsub.f32 0.0, %v632_v37  ;;  %v635_v41 = vadd.f32 %v619_v38, %v593_v62 }
 0x2ec   : > { %v617_v42 = vpop.permute.xlu0 %616 }
 0x2ed   : > { %976 = vpow2.f32 %v654_v39  ;;  %v652_v43 = vmul.f32 1.442695, %v640_v40  ;;  %v643_v44 = vsub.f32 0.0, %v635_v41  ;;  %v634_v45 = vadd.f32 %v617_v42, %v588_v3 }
 0x2ef   : > { %978 = vpow2.f32 %v652_v43  ;;  %v658_v46 = vmul.f32 1.442695, %v643_v44  ;;  %v642_v47 = vsub.f32 0.0, %v634_v45 }
 0x2f1   : > { %980 = vpow2.f32 %v658_v46  ;;  %v656_v48 = vmul.f32 1.442695, %v642_v47 }
 0x2f2   : > { %v969_v49 = vpop.eup %968 }
 0x2f3   : > { %v661_v50 = vadd.f32 1.0, %v969_v49  ;;  %982 = vpow2.f32 %v656_v48 }
 0x2f4   : > { %v971_v51 = vpop.eup %970 }
 0x2f5   : > { %984 = vrcp.f32 %v661_v50  ;;  %v660_v52 = vadd.f32 1.0, %v971_v51 }
 0x2f6   : > { %v973_v53 = vpop.eup %972 }
 0x2f7   : > { %986 = vrcp.f32 %v660_v52  ;;  %v663_v54 = vadd.f32 1.0, %v973_v53 }
 0x2f8   : > { %v975_v55 = vpop.eup %974 }
 0x2f9   : > { %988 = vrcp.f32 %v663_v54  ;;  %v662_v56 = vadd.f32 1.0, %v975_v55 }
 0x2fa   : > { %v977_v57 = vpop.eup %976 }
 0x2fb   : > { %990 = vrcp.f32 %v662_v56  ;;  %v665_v58 = vadd.f32 1.0, %v977_v57 }
 0x2fc   : > { %v979_v59 = vpop.eup %978 }
 0x2fd   : > { %992 = vrcp.f32 %v665_v58  ;;  %v664_v60 = vadd.f32 1.0, %v979_v59 }
 0x2fe   : > { %v981_v61 = vpop.eup %980 }
 0x2ff   : > { %994 = vrcp.f32 %v664_v60  ;;  %v667_v62 = vadd.f32 1.0, %v981_v61 }
 0x300   : > { %v983_v63 = vpop.eup %982 }
 0x301   : > { %996 = vrcp.f32 %v667_v62  ;;  %v666_v3 = vadd.f32 1.0, %v983_v63 }
 0x302   : > { %v985_v4 = vpop.eup %984 }
 0x303   : > { %998 = vrcp.f32 %v666_v3  ;;  %683 = vperm.xlu1 %967, %v985_v4  }
 0x304   : > { %v987_v8 = vpop.eup %986 }
 0x305   : > { %678 = vperm.xlu0 %966, %v987_v8  }
 0x306   : > { %v989_v9 = vpop.eup %988 }
 0x307   : > { %693 = vperm.xlu1 %967, %v989_v9  }
 0x308   : > { %v991_v12 = vpop.eup %990 }
 0x309   : > { %688 = vperm.xlu0 %966, %v991_v12  }
 0x30a   : > { %v993_v13 = vpop.eup %992 }
 0x30b   : > { %703 = vperm.xlu1 %967, %v993_v13  }
 0x30c   : > { %v995_v16 = vpop.eup %994 }
 0x30d   : > { %698 = vperm.xlu0 %966, %v995_v16  }
 0x30e   : > { %v997_v17 = vpop.eup %996 }
 0x30f   : > { %713 = vperm.xlu1 %967, %v997_v17  }
 0x310   : > { %v999_v20 = vpop.eup %998 }
 0x311   : > { %708 = vperm.xlu0 %966, %v999_v20  }
 0x37e   : > { %v684_v21 = vpop.permute.xlu1 %683 }
 0x37f   : > { %v718_v22 = vmul.f32 %v684_v21, %v1301_v23  ;;  %v719_v25 = vmul.f32 %v684_v21, %v1304_v24 }
 0x380   : > { %v679_v26 = vpop.permute.xlu0 %678 }
 0x381   : > { %734 = vst [vmem:[%s1406_s11 + $0x10] sm:$0xff] %v718_v22  ;;  %735 = vst [vmem:[%s1406_s11 + $0x18] sm:$0xff] %v719_v25  ;;  %v716_v29 = vmul.f32 %v679_v26, %v1311_v27  ;;  %v717_v23 = vmul.f32 %v679_v26, %v1314_v28 }
 0x382   : > { %v694_v30 = vpop.permute.xlu1 %693 }
 0x383   : > { %732 = vst [vmem:[%s1406_s11] sm:$0xff] %v716_v29  ;;  %733 = vst [vmem:[%s1406_s11 + $0x8] sm:$0xff] %v717_v23  ;;  %v722_v24 = vmul.f32 %v694_v30, %v1280_v14  ;;  %v723_v31 = vmul.f32 %v694_v30, %v1283_v15 }
 0x384   : > { %v689_v32 = vpop.permute.xlu0 %688 }
 0x385   : > { %738 = vst [vmem:[%s1406_s11 + $0x30] sm:$0xff] %v722_v24  ;;  %739 = vst [vmem:[%s1406_s11 + $0x38] sm:$0xff] %v723_v31  ;;  %v720_v33 = vmul.f32 %v689_v32, %v1290_v18  ;;  %v721_v27 = vmul.f32 %v689_v32, %v1293_v19 }
 0x386   : > { %v704_v28 = vpop.permute.xlu1 %703 }
 0x387   : > { %736 = vst [vmem:[%s1406_s11 + $0x20] sm:$0xff] %v720_v33  ;;  %737 = vst [vmem:[%s1406_s11 + $0x28] sm:$0xff] %v721_v27  ;;  %v726_v34 = vmul.f32 %v704_v28, %v1260_v6  ;;  %v727_v14 = vmul.f32 %v704_v28, %v1263_v7 }
 0x388   : > { %v699_v15 = vpop.permute.xlu0 %698 }
 0x389   : > { %742 = vst [vmem:[%s1406_s11 + $0x50] sm:$0xff] %v726_v34  ;;  %743 = vst [vmem:[%s1406_s11 + $0x58] sm:$0xff] %v727_v14  ;;  %v724_v35 = vmul.f32 %v699_v15, %v1270_v10  ;;  %v725_v18 = vmul.f32 %v699_v15, %v1273_v11 }
 0x38a   : > { %v714_v19 = vpop.permute.xlu1 %713 }
 0x38b   : > { %740 = vst [vmem:[%s1406_s11 + $0x40] sm:$0xff] %v724_v35  ;;  %741 = vst [vmem:[%s1406_s11 + $0x48] sm:$0xff] %v725_v18  ;;  %v730_v6 = vmul.f32 %v714_v19, %v1244_v0  ;;  %v731_v7 = vmul.f32 %v714_v19, %v1247_v1 }
 0x38c   : > { %v709_v36 = vpop.permute.xlu0 %708 }
 0x38d   : > { %746 = vst [vmem:[%s1406_s11 + $0x70] sm:$0xff] %v730_v6  ;;  %747 = vst [vmem:[%s1406_s11 + $0x78] sm:$0xff] %v731_v7  ;;  %v728_v10 = vmul.f32 %v709_v36, %v1250_v2  ;;  %v729_v11 = vmul.f32 %v709_v36, %v1257_v5 }
 0x38f   : > { %744 = vst [vmem:[%s1406_s11 + $0x60] sm:$0xff] %v728_v10  ;;  %745 = vst [vmem:[%s1406_s11 + $0x68] sm:$0xff] %v729_v11 }
 0x390   : > { %1041 = shalt.err (!%p1038_p10)
}
 0x391   : > { %s1042_s16 = scalar_lea.hbm %s1437_s28, 2048  ;;  %s1046_s9 = scalar_lea.hbm %s1493_s5, 4096 }
 0x392   : > { %p1043_p0 = scmp.ne.s32.totalorder %s1437_s28, %s1042_s16  ;;  %p1047_p1 = scmp.lt.s32.totalorder %s1437_s28, %s1493_s5 }
 0x393   : > { %p1048_p3 = scmp.lt.s32.totalorder %s1046_s9, %s1042_s16 }
 0x394   : > { %p1044_p2 = pnand %p1043_p0, %p1502_p12 }
 0x395   : > { %p1049_p6 = por %p1048_p3, %p1047_p1 }
 0x396   : > { %p1045_p9 = pneg %p1044_p2 }
 0x398   : > { %p1050_p11 = pnand %p1049_p6, %p1045_p9 }
 0x39a   : > { %1053 = shalt.err (!%p1050_p11)
}
 0x39b   : > { %s1102_s25 = smov 256   ;;  %s1103_s17 = smov 16  }
 0x39c   : > { %914 = dma.vmem_to_hbm [thread:$0]  (%p1502_p12), %s1439_s13, 2048, %s1437_s28, %s749_s22, %s1102_s25, %s1102_s25, %s1103_s17  }
 0x39d PF: > { %s777_s26 = sand.u32 1, %s1080_s18   ;;  %p1503_p13 = scmp.ne.s32.totalorder %s1499_s6, 0 }
 0x39e   : > { %p1504_p4 = scmp.ge.s32.totalorder %s1092_s21, 2  ;;  %s778_s29 = scalar_lea.sflag [#allocation4], %s777_s26 }
 0x3a0   : > { %p921_p5 = pnand %p1504_p4, %p1503_p13 }
 0x3a2   : > { %p922_p7 = pneg %p921_p5 }
 0x3a4   : > { %1075 = dma.done.wait (%p922_p7), %s778_s29, 2048  }
 0x3a5   : > { %1077 = vsyncadd (%p922_p7), %s778_s29, 4294965248  ;;  %p18_p8 = scmp.ge.s32.totalorder %s1159_s24, 4   ;;  %s1505_s18 = smov %s1084_s19 }
 0x3a6   : > { %s1506_s19 = smov %s1088_s20  ;;  %s1507_s20 = smov %s1171_s27 }
 0x3a7   : > { %s1508_s21 = smov %s1159_s24  ;;  %20 = sbr.rel (!%p18_p8) target bundleno = 5 (0x5), region = 85 }
 0x3ac   :  { %783 = vsyncpa [#allocation3], 1 }
 0x3ad   :  { %785 = vsyncpa [#allocation3 + $0x1], 1 }
 0x3ae   :  { %786 = vsyncpa [#allocation4], 1 }
 0x3af   :  { %788 = vsyncpa [#allocation4 + $0x1], 1 }

</bundles_post_ra>
